<compile_context>
chip_gen: v5e
topology: v5e:2x2
jax: 0.10.0
libtpu: 0.0.40
codegen_flags: <defaults>
</compile_context>

<pallas_src>
import functools
import math

import jax
import jax.numpy as jnp
from jax.experimental import pallas as pl
from jax.experimental.pallas import tpu as pltpu

_LANE = 128


def _round_up(n, m):
    return ((n + m - 1) // m) * m


def _cdiv(a, b):
    return (a + b - 1) // b


def _sublane_multiple(dtype):
    bits = jnp.dtype(dtype).itemsize * 8
    if bits >= 32:
        return 8
    if bits == 16:
        return 16
    return 32


def _mlp_kernel(num_layers, compute_dtype, x_ref, *refs):
    """refs = (w0, b0, w1, b1, ..., w_{L-1}, b_{L-1}, out_ref).

    Weights are already transposed to (in, out) and zero-padded to lane
    multiples, so each layer is a straight MXU matmul + bias + relu.
    All params fit in VMEM, so the whole chain runs per row-tile of x.
    """
    out_ref = refs[-1]
    params = refs[:-1]

    h = x_ref[...].astype(compute_dtype)
    for i in range(num_layers):
        w = params[2 * i][...]                          # (in_p, out_p)
        b = params[2 * i + 1][...].astype(jnp.float32)  # (1, out_p)
        acc = jnp.dot(h, w, preferred_element_type=jnp.float32) + b
        if i < num_layers - 1:
            acc = jnp.maximum(acc, 0.0)                 # relu on all but last layer
            h = acc.astype(compute_dtype)
        else:
            h = acc
    out_ref[...] = h.astype(out_ref.dtype)


def mlp_forward(x, weights, biases, *, tile_m=512, compute_dtype=None,
                min_grid_steps=1):
    """x: (..., input_dim). weights[i]: (out_i, in_i) (nn.Linear layout). biases[i]: (out_i,).

    compute_dtype: dtype of matmul operands AND of the resident activation
      stream (pass jnp.bfloat16 on v6e/v7x to halve the dominant x DMA).
      Accumulation is always f32; output dtype matches x.
    min_grid_steps: set >=2 on v7x so both TensorCores get a grid step.
    """
    num_layers = len(weights)
    orig_shape = x.shape
    in_dim = orig_shape[-1]
    out_dim = int(weights[-1].shape[0])
    if compute_dtype is None:
        compute_dtype = x.dtype
    compute_dtype = jnp.dtype(compute_dtype)
    out_dtype = x.dtype

    x2d = x.reshape(-1, in_dim)
    M = x2d.shape[0]

    # --- Feature dims: lane-pad hidden/output dims; keep small input dim as-is. ---
    dims = [in_dim] + [int(w.shape[0]) for w in weights]
    pdims = [_round_up(d, _LANE) for d in dims]
    if in_dim < _LANE:
        pdims[0] = in_dim            # full-array last dim is a legal block; avoids 8x x-read blowup
    k0 = pdims[0]
    out_pad = pdims[-1]

    # --- Row tiling: dtype-aware sublane multiple, ragged-minimizing tiles. ---
    sub = max(_sublane_multiple(compute_dtype), _sublane_multiple(out_dtype))
    target = max(sub, _round_up(tile_m, sub))
    n_tiles = max(int(min_grid_steps), _cdiv(M, target), 1)
    n_tiles = min(n_tiles, max(1, _cdiv(M, sub)))    # each tile >= one sublane group
    tile_rows = _round_up(_cdiv(M, n_tiles), sub)
    Mp = tile_rows * n_tiles

    # --- Pad / cast x; fast path skips the pad copy when it would be a no-op. ---
    if (k0 != in_dim) or (Mp != M):
        x_p = (jnp.zeros((Mp, k0), compute_dtype)
               .at[:M, :in_dim].set(x2d.astype(compute_dtype)))
    elif x2d.dtype != compute_dtype:
        x_p = x2d.astype(compute_dtype)
    else:
        x_p = x2d

    # --- Pre-transpose weights once to (in, out); zero-pad weights & biases. ---
    w_p, b_p = [], []
    for li, (w, b) in enumerate(zip(weights, biases)):
        di, do = pdims[li], pdims[li + 1]
        wt = w.T.astype(compute_dtype)
        if wt.shape != (di, do):
            wt = (jnp.zeros((di, do), compute_dtype)
                  .at[: w.shape[1], : w.shape[0]].set(wt))
        bf = b.astype(jnp.float32)
        if bf.shape[0] != do:
            bb = jnp.zeros((1, do), jnp.float32).at[0, : b.shape[0]].set(bf)
        else:
            bb = bf.reshape(1, do)
        w_p.append(wt)
        b_p.append(bb)

    grid = (n_tiles,)

    in_specs = [pl.BlockSpec((tile_rows, k0), lambda i: (i, 0))]
    for li in range(num_layers):
        in_specs.append(pl.BlockSpec(w_p[li].shape, lambda i: (0, 0)))
        in_specs.append(pl.BlockSpec(b_p[li].shape, lambda i: (0, 0)))
    out_specs = pl.BlockSpec((tile_rows, out_pad), lambda i: (i, 0))

    # --- Cost estimate for XLA's scheduler. ---
    isize = lambda dt: jnp.dtype(dt).itemsize
    flops = 2 * Mp * sum(pdims[i] * pdims[i + 1] for i in range(num_layers))
    bytes_accessed = (Mp * k0 * isize(compute_dtype)
                      + sum(math.prod(w.shape) * isize(compute_dtype) for w in w_p)
                      + sum(math.prod(b.shape) * 4 for b in b_p)
                      + Mp * out_pad * isize(out_dtype))
    cost = pl.CostEstimate(flops=flops, transcendentals=0,
                           bytes_accessed=bytes_accessed)

    # --- Only set vmem_limit_bytes when double-buffered tiles + params exceed
    #     the smallest scoped default (v5e: 16 MiB). ---
    vmem_est = (2 * tile_rows * k0 * isize(compute_dtype)
                + 2 * tile_rows * out_pad * isize(out_dtype)
                + 2 * sum(math.prod(w.shape) * isize(compute_dtype) for w in w_p)
                + 2 * sum(math.prod(b.shape) * 4 for b in b_p))
    cp_kwargs = dict(dimension_semantics=("parallel",))
    if vmem_est > 12 * 1024 * 1024:
        cp_kwargs["vmem_limit_bytes"] = int(min(vmem_est * 5 // 4 + (2 << 20),
                                                48 * 1024 * 1024))

    kernel = functools.partial(_mlp_kernel, num_layers, compute_dtype)

    flat_args = [x_p]
    for w, b in zip(w_p, b_p):
        flat_args.extend([w, b])

    y = pl.pallas_call(
        kernel,
        out_shape=jax.ShapeDtypeStruct((Mp, out_pad), out_dtype),
        grid_spec=pltpu.PrefetchScalarGridSpec(
            num_scalar_prefetch=0,
            grid=grid,
            in_specs=in_specs,
            out_specs=out_specs,
        ),
        compiler_params=pltpu.CompilerParams(**cp_kwargs),
        cost_estimate=cost,
    )(*flat_args)

    # Slice real rows / real output features off the lane-padded slab.
    return y[:M, :out_dim].reshape(*orig_shape[:-1], out_dim)


def make_mlp_params(key, input_dim, hidden_dim, output_dim, num_layers, dtype=jnp.float32):
    """Deterministic synthetic parameters with nn.Linear shapes: W (out, in), b (out,)."""
    h = [hidden_dim] * (num_layers - 1)
    dims_in = [input_dim] + h
    dims_out = h + [output_dim]
    weights, biases = [], []
    for n, k in zip(dims_in, dims_out):
        key, kw, kb = jax.random.split(key, 3)
        bound = 1.0 / (n ** 0.5)
        weights.append(jax.random.uniform(kw, (k, n), dtype, -bound, bound))
        biases.append(jax.random.uniform(kb, (k,), dtype, -bound, bound))
    return weights, biases


def mlp_reference(x, weights, biases):
    """Plain-JAX reference mirroring the PyTorch forward (f32-exact matmuls)."""
    num_layers = len(weights)
    h = x
    for i, (w, b) in enumerate(zip(weights, biases)):
        h = jnp.dot(h, w.T, precision=jax.lax.Precision.HIGHEST) + b
        if i < num_layers - 1:
            h = jnp.maximum(h, 0.0)
    return h


if __name__ == "__main__":
    # Shapes consistent with the RT-DETR decoder MLP head
    # (e.g. bbox head: input_dim = hidden_dim, output_dim = 4, num_layers = 3).
    batch, seq = 2, 8
    input_dim, hidden_dim, output_dim, num_layers = 16, 32, 4, 3

    key = jax.random.PRNGKey(0)
    key, kx = jax.random.split(key)
    x = jax.random.normal(kx, (batch, seq, input_dim), dtype=jnp.float32)
    weights, biases = make_mlp_params(key, input_dim, hidden_dim, output_dim, num_layers)

    # 1) f32, tiny M (single grid step), small unpadded in_dim.
    y = jax.block_until_ready(mlp_forward(x, weights, biases))
    y_ref = mlp_reference(x, weights, biases)
    assert y.shape == (batch, seq, output_dim), y.shape
    assert jnp.allclose(y, y_ref, atol=1e-5, rtol=1e-5), "mismatch vs reference (f32 small)"

    # 2) f32, larger M: multi-tile grid with ragged-minimizing tile choice (M=600 -> 3x200).
    key, kx2 = jax.random.split(key)
    x_big = jax.random.normal(kx2, (2, 300, input_dim), dtype=jnp.float32)
    y_big = jax.block_until_ready(mlp_forward(x_big, weights, biases, tile_m=256))
    y_big_ref = mlp_reference(x_big, weights, biases)
    assert jnp.allclose(y_big, y_big_ref, atol=1e-5, rtol=1e-5), "mismatch vs reference (f32 big)"

    # 3) forced >=2 grid steps (v7x megacore sharding) on small M.
    y_split = jax.block_until_ready(mlp_forward(x, weights, biases, min_grid_steps=2))
    assert jnp.allclose(y_split, y_ref, atol=1e-5, rtol=1e-5), "mismatch vs reference (split)"

    # 4) bf16 operands + bf16-resident x (v6e/v7x path), f32 accumulation — looser tolerance.
    y_bf16 = jax.block_until_ready(
        mlp_forward(x_big, weights, biases, compute_dtype=jnp.bfloat16))
    assert jnp.allclose(y_bf16, y_big_ref, atol=1e-1, rtol=1e-1), "mismatch vs reference (bf16)"

    # 5) lane-aligned input dims (like the real RT-DETR head) -> wrapper pad is skipped.
    key, kp, kx3 = jax.random.split(key, 3)
    w_al, b_al = make_mlp_params(kp, 128, 128, 4, 3)
    x_al = jax.random.normal(kx3, (2, 256, 128), dtype=jnp.float32)   # M = 512, one tile
    y_al = jax.block_until_ready(mlp_forward(x_al, w_al, b_al))
    assert jnp.allclose(y_al, mlp_reference(x_al, w_al, b_al),
                        atol=1e-4, rtol=1e-4), "mismatch vs reference (aligned fast path)"

    print("KERNEL_OK")
</pallas_src>

<mosaic_0001>
module attributes {stable_mosaic.version = 11 : i64} {
  func.func @_mlp_kernel(%arg0: i32, %arg1: memref<16x16xf32, #tpu.memory_space<vmem>>, %arg2: memref<16x128xf32, #tpu.memory_space<vmem>>, %arg3: memref<1x128xf32, #tpu.memory_space<vmem>>, %arg4: memref<128x128xf32, #tpu.memory_space<vmem>>, %arg5: memref<1x128xf32, #tpu.memory_space<vmem>>, %arg6: memref<128x128xf32, #tpu.memory_space<vmem>>, %arg7: memref<1x128xf32, #tpu.memory_space<vmem>>, %arg8: memref<16x128xf32, #tpu.memory_space<vmem>>) attributes {dimension_semantics = [#tpu.dimension_semantics<parallel>], iteration_bounds = array<i64: 1>, scalar_prefetch = 0 : i64, scratch_operands = 0 : i64, tpu.core_type = #tpu.core_type<tc>, window_params = [{transform_indices = @transform_0, window_bounds = array<i64: 16, 16>}, {pipeline_mode = #tpu.pipeline_mode<synchronous>, transform_indices = @transform_1, window_bounds = array<i64: 16, 128>}, {pipeline_mode = #tpu.pipeline_mode<synchronous>, transform_indices = @transform_2, window_bounds = array<i64: 1, 128>}, {pipeline_mode = #tpu.pipeline_mode<synchronous>, transform_indices = @transform_3, window_bounds = array<i64: 128, 128>}, {pipeline_mode = #tpu.pipeline_mode<synchronous>, transform_indices = @transform_4, window_bounds = array<i64: 1, 128>}, {pipeline_mode = #tpu.pipeline_mode<synchronous>, transform_indices = @transform_5, window_bounds = array<i64: 128, 128>}, {pipeline_mode = #tpu.pipeline_mode<synchronous>, transform_indices = @transform_6, window_bounds = array<i64: 1, 128>}, {transform_indices = @transform_7, window_bounds = array<i64: 16, 128>}]} {
    %c0 = arith.constant 0 : index
    %c0_0 = arith.constant 0 : index
    %0 = vector.load %arg1[%c0, %c0_0] : memref<16x16xf32, #tpu.memory_space<vmem>>, vector<16x16xf32>
    %c0_1 = arith.constant 0 : index
    %c0_2 = arith.constant 0 : index
    %1 = vector.load %arg2[%c0_1, %c0_2] : memref<16x128xf32, #tpu.memory_space<vmem>>, vector<16x128xf32>
    %c0_3 = arith.constant 0 : index
    %c0_4 = arith.constant 0 : index
    %2 = vector.load %arg3[%c0_3, %c0_4] : memref<1x128xf32, #tpu.memory_space<vmem>>, vector<1x128xf32>
    %cst = arith.constant dense<0.000000e+00> : vector<16x128xf32>
    %3 = tpu.matmul %0, %1, %cst {dimension_numbers = #tpu.dot_dimension_numbers<[1], [0], [0], [1], [0, 0, 1, 1], [], []>} : vector<16x16xf32>, vector<16x128xf32>, vector<16x128xf32> -> vector<16x128xf32>
    %4 = vector.broadcast %2 : vector<1x128xf32> to vector<16x128xf32>
    %5 = arith.addf %3, %4 : vector<16x128xf32>
    %cst_5 = arith.constant 0.000000e+00 : f32
    %6 = vector.broadcast %cst_5 : f32 to vector<16x128xf32>
    %7 = arith.maximumf %5, %6 : vector<16x128xf32>
    %c0_6 = arith.constant 0 : index
    %c0_7 = arith.constant 0 : index
    %8 = vector.load %arg4[%c0_6, %c0_7] : memref<128x128xf32, #tpu.memory_space<vmem>>, vector<128x128xf32>
    %c0_8 = arith.constant 0 : index
    %c0_9 = arith.constant 0 : index
    %9 = vector.load %arg5[%c0_8, %c0_9] : memref<1x128xf32, #tpu.memory_space<vmem>>, vector<1x128xf32>
    %cst_10 = arith.constant dense<0.000000e+00> : vector<16x128xf32>
    %10 = tpu.matmul %7, %8, %cst_10 {dimension_numbers = #tpu.dot_dimension_numbers<[1], [0], [0], [1], [0, 0, 1, 1], [], []>} : vector<16x128xf32>, vector<128x128xf32>, vector<16x128xf32> -> vector<16x128xf32>
    %11 = vector.broadcast %9 : vector<1x128xf32> to vector<16x128xf32>
    %12 = arith.addf %10, %11 : vector<16x128xf32>
    %cst_11 = arith.constant 0.000000e+00 : f32
    %13 = vector.broadcast %cst_11 : f32 to vector<16x128xf32>
    %14 = arith.maximumf %12, %13 : vector<16x128xf32>
    %c0_12 = arith.constant 0 : index
    %c0_13 = arith.constant 0 : index
    %15 = vector.load %arg6[%c0_12, %c0_13] : memref<128x128xf32, #tpu.memory_space<vmem>>, vector<128x128xf32>
    %c0_14 = arith.constant 0 : index
    %c0_15 = arith.constant 0 : index
    %16 = vector.load %arg7[%c0_14, %c0_15] : memref<1x128xf32, #tpu.memory_space<vmem>>, vector<1x128xf32>
    %cst_16 = arith.constant dense<0.000000e+00> : vector<16x128xf32>
    %17 = tpu.matmul %14, %15, %cst_16 {dimension_numbers = #tpu.dot_dimension_numbers<[1], [0], [0], [1], [0, 0, 1, 1], [], []>} : vector<16x128xf32>, vector<128x128xf32>, vector<16x128xf32> -> vector<16x128xf32>
    %18 = vector.broadcast %16 : vector<1x128xf32> to vector<16x128xf32>
    %19 = arith.addf %17, %18 : vector<16x128xf32>
    %c0_17 = arith.constant 0 : index
    %c0_18 = arith.constant 0 : index
    %20 = vector.load %arg8[%c0_17, %c0_18] : memref<16x128xf32, #tpu.memory_space<vmem>>, vector<16x128xf32>
    tpu.vector_store %arg8[%c0_17, %c0_18], %19 {strides = array<i32>} : memref<16x128xf32, #tpu.memory_space<vmem>>, vector<16x128xf32>,
    return
  }
  func.func @transform_0(%arg0: i32) -> (i32, i32) {
    %c0_i32 = arith.constant 0 : i32
    %c0_i32_0 = arith.constant 0 : i32
    return %arg0, %c0_i32 : i32, i32
  }
  func.func @transform_1(%arg0: i32) -> (i32, i32) {
    %c0_i32 = arith.constant 0 : i32
    %c0_i32_0 = arith.constant 0 : i32
    %c0_i32_1 = arith.constant 0 : i32
    return %c0_i32, %c0_i32_0 : i32, i32
  }
  func.func @transform_2(%arg0: i32) -> (i32, i32) {
    %c0_i32 = arith.constant 0 : i32
    %c0_i32_0 = arith.constant 0 : i32
    %c0_i32_1 = arith.constant 0 : i32
    return %c0_i32, %c0_i32_0 : i32, i32
  }
  func.func @transform_3(%arg0: i32) -> (i32, i32) {
    %c0_i32 = arith.constant 0 : i32
    %c0_i32_0 = arith.constant 0 : i32
    %c0_i32_1 = arith.constant 0 : i32
    return %c0_i32, %c0_i32_0 : i32, i32
  }
  func.func @transform_4(%arg0: i32) -> (i32, i32) {
    %c0_i32 = arith.constant 0 : i32
    %c0_i32_0 = arith.constant 0 : i32
    %c0_i32_1 = arith.constant 0 : i32
    return %c0_i32, %c0_i32_0 : i32, i32
  }
  func.func @transform_5(%arg0: i32) -> (i32, i32) {
    %c0_i32 = arith.constant 0 : i32
    %c0_i32_0 = arith.constant 0 : i32
    %c0_i32_1 = arith.constant 0 : i32
    return %c0_i32, %c0_i32_0 : i32, i32
  }
  func.func @transform_6(%arg0: i32) -> (i32, i32) {
    %c0_i32 = arith.constant 0 : i32
    %c0_i32_0 = arith.constant 0 : i32
    %c0_i32_1 = arith.constant 0 : i32
    return %c0_i32, %c0_i32_0 : i32, i32
  }
  func.func @transform_7(%arg0: i32) -> (i32, i32) {
    %c0_i32 = arith.constant 0 : i32
    %c0_i32_0 = arith.constant 0 : i32
    return %arg0, %c0_i32 : i32, i32
  }
}

</mosaic_0001>

<bundles_post_ra>
// kernel: tpu_custom_call.1
= control target key start
LH: loop header
LB: loop body
LE: loop exit
PB: predicated region body
PF: predicated region fallthrough
CT: control target
= control target key end

     0   :  { %12 = vsyncpa [#allocation3], 0  ;;  %s501_s0 = inlined_call_operand.hbm [shape: f32[16,16], index: 0, kind: input, shape index: {}]   ;;  %s502_s1 = inlined_call_operand.hbm [shape: f32[16,128], index: 1, kind: input, shape index: {}]   ;;  %s503_s2 = inlined_call_operand.vmem [shape: f32[1,128], index: 2, kind: input, shape index: {}]   ;;  %s504_s3 = inlined_call_operand.hbm [shape: f32[128,128], index: 3, kind: input, shape index: {}]   ;;  %s505_s4 = inlined_call_operand.vmem [shape: f32[1,128], index: 4, kind: input, shape index: {}]   ;;  %s506_s5 = inlined_call_operand.hbm [shape: f32[128,128], index: 5, kind: input, shape index: {}]   ;;  %s507_s6 = inlined_call_operand.vmem [shape: f32[1,128], index: 6, kind: input, shape index: {}]   ;;  %s508_s7 = inlined_call_operand.hbm [shape: f32[16,128], index: 7, kind: output, shape index: {}]  }
   0x1   :  { %13 = vsyncpa [#allocation6], 0 }
   0x2   :  { %14 = vsyncpa [#allocation9], 0 }
   0x3   :  { %15 = vsyncpa [#allocation4], 0  ;;  %s33_s26 = sshll.u32 %s502_s1, 4  ;;  %s413_s27 = smov [#allocation5]   ;;  %s34_s26 = int_to_ptr.hbm [resolvable:$true] %s33_s26 }
   0x4   :  { %s35_s28 = sshll.u32 %s413_s27, 4  ;;  %s20_s8 = sshll.u32 %s501_s0, 4  ;;  %s36_s28 = int_to_ptr.vmem [resolvable:$true] %s35_s28  ;;  %s21_s8 = int_to_ptr.hbm [resolvable:$true] %s20_s8 }
   0x5   :  { %s414_s9 = smov 128   ;;  %s415_s10 = smov 8  }
   0x6   :  { %41 = dma.hbm_to_vmem [thread:$0]  %s34_s26, 256, %s36_s28, [#allocation6], %s414_s9, %s414_s9, %s415_s10  }
   0x7   :  { %s416_s11 = smov [#allocation2]   ;;  %s48_s1 = sshll.u32 %s504_s3, 4  ;;  %s49_s1 = int_to_ptr.hbm [resolvable:$true] %s48_s1 }
   0x8   :  { %s22_s12 = sshll.u32 %s416_s11, 4  ;;  %s63_s16 = sshll.u32 %s506_s5, 4  ;;  %s23_s12 = int_to_ptr.vmem [resolvable:$true] %s22_s12  ;;  %s64_s16 = int_to_ptr.hbm [resolvable:$true] %s63_s16 }
   0x9   :  { %28 = dma.hbm_to_vmem [thread:$0]  %s21_s8, 256, %s23_s12, [#allocation3], %s414_s9, %s414_s9, %s415_s10  }
   0xa   :  { %s417_s17 = smov [#allocation7]   ;;  %s418_s19 = smov [#allocation8]  }
   0xb   :  { %s50_s18 = sshll.u32 %s417_s17, 4  ;;  %s65_s3 = sshll.u32 %s418_s19, 4  ;;  %s51_s18 = int_to_ptr.vmem [resolvable:$true] %s50_s18  ;;  %s66_s3 = int_to_ptr.vmem [resolvable:$true] %s65_s3 }
   0xc   :  { %56 = dma.hbm_to_vmem [thread:$0]  %s49_s1, 2048, %s51_s18, [#allocation6], %s414_s9, %s414_s9, %s415_s10  }
   0xd   :  { %71 = dma.hbm_to_vmem [thread:$0]  %s64_s16, 2048, %s66_s3, [#allocation9], %s414_s9, %s414_s9, %s415_s10  }
   0xe   :  { %405 = dma.done.wait [#allocation3], 256  }
   0xf   :  { %406 = vsyncadd [#allocation3], 4294967040 }
  0x10   :  { %407 = dma.done.wait [#allocation6], 2304  }
  0x11   :  { %408 = vsyncadd [#allocation6], 4294964992 }
  0x12   :  { %409 = dma.done.wait [#allocation9], 2048  }
  0x13   :  { %410 = vsyncadd [#allocation9], 4294965248  ;;  %v93_v0 = vld [vmem:[#allocation5 + $0x8] sm:$0xff]  ;;  %v92_v1 = vld [vmem:[#allocation5] sm:$0xff]  ;;  %vm98_vm0 = vcmask 130048   ;;  %s419_s24 = smov [#allocation10]  }
  0x14   :  { %119 = vmatpush.msra.mxu0 %v93_v0  ;;  %v90_v2 = vld [vmem:[#allocation2] sm:$0xff]  ;;  %v145_v3 = vld [vmem:[#allocation7 + $0x78] sm:$0xff]  ;;  %v144_v4 = vld [vmem:[#allocation7 + $0x70] sm:$0xff]  ;;  %s224_s25 = sshll.u32 %s419_s24, 4  ;;  %s225_s25 = int_to_ptr.vmem [resolvable:$true] %s224_s25 }
  0x15   :  { %150 = vmatpush.msra.mxu1 %v145_v3  ;;  %243 = vmatpush.msra.mxu3 %v145_v3  ;;  %v143_v5 = vld [vmem:[#allocation7 + $0x68] sm:$0xff]  ;;  %v142_v6 = vld [vmem:[#allocation7 + $0x60] sm:$0xff]  ;;  %v141_v7 = vld [vmem:[#allocation7 + $0x58] sm:$0xff] }
  0x16   :  { %120 = vmatpush.msra.mxu0 %v92_v1  ;;  %v91_v8 = vld [vmem:[#allocation2 + $0x8] sm:$0xff]  ;;  %v140_v9 = vld [vmem:[#allocation7 + $0x50] sm:$0xff]  ;;  %v138_v11 = vld [vmem:[#allocation7 + $0x40] sm:$0xff] }
  0x17   :  { %241 = vmatmul.msk.f32.vlgmr.msra.gmra.mxu0 %vm98_vm0, %v90_v2  ;;  %151 = vmatpush.msra.mxu1 %v144_v4  ;;  %v139_v10 = vld [vmem:[#allocation7 + $0x48] sm:$0xff]  ;;  %v137_v12 = vld [vmem:[#allocation7 + $0x38] sm:$0xff]  ;;  %v136_v13 = vld [vmem:[#allocation7 + $0x30] sm:$0xff] }
  0x18   :  { %244 = vmatpush.msra.mxu3 %v144_v4  ;;  %v135_v14 = vld [vmem:[#allocation7 + $0x28] sm:$0xff]  ;;  %v134_v15 = vld [vmem:[#allocation7 + $0x20] sm:$0xff]  ;;  %v133_v16 = vld [vmem:[#allocation7 + $0x18] sm:$0xff] }
  0x19   :  { %152 = vmatpush.msra.mxu1 %v143_v5  ;;  %v132_v17 = vld [vmem:[#allocation7 + $0x10] sm:$0xff]  ;;  %v131_v18 = vld [vmem:[#allocation7 + $0x8] sm:$0xff]  ;;  %v130_v19 = vld [vmem:[#allocation7] sm:$0xff] }
  0x1a   :  { %245 = vmatpush.msra.mxu3 %v143_v5  ;;  %v190_v20 = vld [vmem:[#allocation8 + $0x78] sm:$0xff]  ;;  %v189_v21 = vld [vmem:[#allocation8 + $0x70] sm:$0xff]  ;;  %v188_v22 = vld [vmem:[#allocation8 + $0x68] sm:$0xff] }
  0x1b   :  { %153 = vmatpush.msra.mxu1 %v142_v6  ;;  %195 = vmatpush.msrb.mxu0 %v190_v20  ;;  %v187_v23 = vld [vmem:[#allocation8 + $0x60] sm:$0xff]  ;;  %v186_v24 = vld [vmem:[#allocation8 + $0x58] sm:$0xff]  ;;  %v185_v25 = vld [vmem:[#allocation8 + $0x50] sm:$0xff] }
  0x1c   :  { %246 = vmatpush.msra.mxu3 %v142_v6  ;;  %259 = vmatpush.msra.mxu2 %v190_v20  ;;  %v184_v26 = vld [vmem:[#allocation8 + $0x48] sm:$0xff]  ;;  %v183_v27 = vld [vmem:[#allocation8 + $0x40] sm:$0xff]  ;;  %v182_v28 = vld [vmem:[#allocation8 + $0x38] sm:$0xff] }
  0x1d   :  { %154 = vmatpush.msra.mxu1 %v141_v7  ;;  %196 = vmatpush.msrb.mxu0 %v189_v21  ;;  %v282_v29 = vld [vmem:[%s503_s2] ss:$0 sm:$0xff]  ;;  %v181_v30 = vld [vmem:[#allocation8 + $0x30] sm:$0xff]  ;;  %v180_v31 = vld [vmem:[#allocation8 + $0x28] sm:$0xff] }
  0x1e   :  { %247 = vmatpush.msra.mxu3 %v141_v7  ;;  %260 = vmatpush.msra.mxu2 %v189_v21  ;;  %v179_v34 = vld [vmem:[#allocation8 + $0x20] sm:$0xff]  ;;  %v178_v36 = vld [vmem:[#allocation8 + $0x18] sm:$0xff]  ;;  %v177_v40 = vld [vmem:[#allocation8 + $0x10] sm:$0xff] }
  0x1f   :  { %242 = vmatmul.msk.f32.gmra.mxu0 %vm98_vm0, %v91_v8  ;;  %155 = vmatpush.msra.mxu1 %v140_v9  ;;  %v176_v41 = vld [vmem:[#allocation8 + $0x8] sm:$0xff]  ;;  %v175_v42 = vld [vmem:[#allocation8] sm:$0xff] }
  0x20   :  { %248 = vmatpush.msra.mxu3 %v140_v9  ;;  %197 = vmatpush.msrb.mxu0 %v188_v22  ;;  %v283_v43 = vld [vmem:[%s505_s4] ss:$0 sm:$0xff]  ;;  %s226_s4 = sshll.u32 %s508_s7, 4  ;;  %s227_s4 = int_to_ptr.hbm [resolvable:$true] %s226_s4 }
  0x21   :  { %156 = vmatpush.msra.mxu1 %v139_v10  ;;  %261 = vmatpush.msra.mxu2 %v188_v22  ;;  %v284_v50 = vld [vmem:[%s507_s6] ss:$0 sm:$0xff] }
  0x22   :  { %249 = vmatpush.msra.mxu3 %v139_v10  ;;  %198 = vmatpush.msrb.mxu0 %v187_v23 }
  0x23   :  { %157 = vmatpush.msra.mxu1 %v138_v11  ;;  %262 = vmatpush.msra.mxu2 %v187_v23 }
  0x24   :  { %250 = vmatpush.msra.mxu3 %v138_v11  ;;  %199 = vmatpush.msrb.mxu0 %v186_v24 }
  0x25   :  { %158 = vmatpush.msra.mxu1 %v137_v12  ;;  %263 = vmatpush.msra.mxu2 %v186_v24 }
  0x26   :  { %251 = vmatpush.msra.mxu3 %v137_v12  ;;  %200 = vmatpush.msrb.mxu0 %v185_v25 }
  0x27   :  { %159 = vmatpush.msra.mxu1 %v136_v13  ;;  %264 = vmatpush.msra.mxu2 %v185_v25 }
  0x28   :  { %252 = vmatpush.msra.mxu3 %v136_v13  ;;  %201 = vmatpush.msrb.mxu0 %v184_v26 }
  0x29   :  { %160 = vmatpush.msra.mxu1 %v135_v14  ;;  %265 = vmatpush.msra.mxu2 %v184_v26 }
  0x2a   :  { %253 = vmatpush.msra.mxu3 %v135_v14  ;;  %202 = vmatpush.msrb.mxu0 %v183_v27 }
  0x2b   :  { %161 = vmatpush.msra.mxu1 %v134_v15  ;;  %266 = vmatpush.msra.mxu2 %v183_v27 }
  0x2c   :  { %254 = vmatpush.msra.mxu3 %v134_v15  ;;  %203 = vmatpush.msrb.mxu0 %v182_v28 }
  0x2d   :  { %162 = vmatpush.msra.mxu1 %v133_v16  ;;  %267 = vmatpush.msra.mxu2 %v182_v28 }
  0x2e   :  { %255 = vmatpush.msra.mxu3 %v133_v16  ;;  %204 = vmatpush.msrb.mxu0 %v181_v30 }
  0x2f   :  { %163 = vmatpush.msra.mxu1 %v132_v17  ;;  %268 = vmatpush.msra.mxu2 %v181_v30 }
  0x30   :  { %256 = vmatpush.msra.mxu3 %v132_v17  ;;  %205 = vmatpush.msrb.mxu0 %v180_v31 }
  0x31   :  { %164 = vmatpush.msra.mxu1 %v131_v18  ;;  %269 = vmatpush.msra.mxu2 %v180_v31 }
  0x32   :  { %257 = vmatpush.msra.mxu3 %v131_v18  ;;  %206 = vmatpush.msrb.mxu0 %v179_v34 }
  0x33   :  { %165 = vmatpush.msra.mxu1 %v130_v19  ;;  %270 = vmatpush.msra.mxu2 %v179_v34 }
  0x34   :  { %258 = vmatpush.msra.mxu3 %v130_v19  ;;  %207 = vmatpush.msrb.mxu0 %v178_v36 }
  0x35   :  { %271 = vmatpush.msra.mxu2 %v178_v36 }
  0x36   :  { %208 = vmatpush.msrb.mxu0 %v177_v40 }
  0x37   :  { %272 = vmatpush.msra.mxu2 %v177_v40 }
  0x38   :  { %209 = vmatpush.msrb.mxu0 %v176_v41 }
  0x39   :  { %273 = vmatpush.msra.mxu2 %v176_v41 }
  0x3a   :  { %210 = vmatpush.msrb.mxu0 %v175_v42 }
  0x3b   :  { %274 = vmatpush.msra.mxu2 %v175_v42 }
  0x94   :  { %v122_v32 = vpop.f32.mrf.mxu0 }
  0x95   :  { %v123_v33 = vadd.f32 %v282_v29, %v122_v32 }
  0x97   :  { %v128_v35 = vmax.f32 %v123_v33, 0.0 }
  0x99   :  { %166 = vmatmul.f32.vlgmr.msra.gmra.mxu1 %v128_v35 }
  0x9c   :  { %v125_v37 = vpop.f32.mrf.mxu0 }
  0x9d   :  { %v126_v38 = vadd.f32 %v282_v29, %v125_v37 }
  0x9f   :  { %v129_v39 = vmax.f32 %v126_v38, 0.0 }
  0xa1   :  { %169 = vmatmul.f32.vlgmr.msra.gmra.mxu3 %v129_v39 }
 0x116   :  { %v167_v44 = vpop.f32.mrf.mxu1 }
 0x117   :  { %v168_v45 = vadd.f32 %v283_v43, %v167_v44 }
 0x119   :  { %v173_v46 = vmax.f32 %v168_v45, 0.0 }
 0x11b   :  { %211 = vmatmul.f32.vlgmr.msrb.gmra.mxu0 %v173_v46 }
 0x124   :  { %v170_v47 = vpop.f32.mrf.mxu3 }
 0x125   :  { %v171_v48 = vadd.f32 %v283_v43, %v170_v47 }
 0x127   :  { %v174_v49 = vmax.f32 %v171_v48, 0.0 }
 0x129   :  { %214 = vmatmul.f32.vlgmr.msra.gmra.mxu2 %v174_v49 }
 0x198   :  { %v212_v51 = vpop.f32.mrf.mxu0 }
 0x199   :  { %v213_v52 = vadd.f32 %v284_v50, %v212_v51 }
 0x19b   :  { %218 = vst [vmem:[#allocation10] sm:$0xff] %v213_v52 }
 0x1ac   :  { %v215_v53 = vpop.f32.mrf.mxu2 }
 0x1ad   :  { %v216_v54 = vadd.f32 %v284_v50, %v215_v53 }
 0x1af   :  { %219 = vst [vmem:[#allocation10 + $0x8] sm:$0xff] %v216_v54 }
 0x1b0   :  { %232 = dma.vmem_to_hbm [thread:$0]  %s225_s25, 256, %s227_s4, [#allocation4], %s414_s9, %s414_s9, %s415_s10  }
 0x1b1   :  { %411 = dma.done.wait [#allocation4], 256  }
 0x1b2   :  { %412 = vsyncadd [#allocation4], 4294967040 }
 0x1b3   :  { %237 = vsyncpa [#allocation3], 1 }
 0x1b4   :  { %238 = vsyncpa [#allocation6], 1 }
 0x1b5   :  { %239 = vsyncpa [#allocation9], 1 }
 0x1b6   :  { %240 = vsyncpa [#allocation4], 1 }

</bundles_post_ra>
